<compile_context>
chip_gen: v7x
topology: tpu7x:2x2x1
jax: 0.10.0
libtpu: 0.0.40
codegen_flags: <defaults>
</compile_context>

<pallas_src>
import jax
import jax.numpy as jnp
from jax.experimental import pallas as pl
from jax.experimental.pallas import tpu as pltpu

# Original module uses d_model=512, d_ff=2048; the demo uses smaller (but
# structurally identical) sizes.
D_MODEL = 128
D_FF = 512
LN_EPS = 1e-5


def ffn_ln_kernel(x_ref, w1_ref, w2_ref, o_ref):
    # x_ref: (tm, d_model) row tile. w1_ref/w2_ref: full weights resident in VMEM.
    x = x_ref[...]  # native dtype straight into the MXU

    # Linear(d_model, d_ff, bias=False) + ReLU; f32 accumulation on the MXU.
    h = jnp.dot(x, w1_ref[...], preferred_element_type=jnp.float32)
    h = jnp.maximum(h, 0.0).astype(w2_ref.dtype)

    # Linear(d_ff, d_model, bias=False); f32 accumulator.
    y = jnp.dot(h, w2_ref[...], preferred_element_type=jnp.float32)

    # Residual add + LayerNorm (stats in f32). LN epilogue uses XLU/EUP slots,
    # which are free filler once the matmul tile is large enough.
    y = y + x.astype(jnp.float32)
    mean = jnp.mean(y, axis=-1, keepdims=True)
    ctr = y - mean
    var = jnp.mean(ctr * ctr, axis=-1, keepdims=True)
    o_ref[...] = (ctr * jax.lax.rsqrt(var + LN_EPS)).astype(o_ref.dtype)


def _round_up(n, m):
    return ((n + m - 1) // m) * m


def poswise_feed_forward(x, w1, w2, *, tm=256):
    """x: [B, S, d_model] -> [B, S, d_model]. w1: [d_model, d_ff], w2: [d_ff, d_model]."""
    B, S, D = x.shape
    assert D == D_MODEL and w1.shape == (D_MODEL, D_FF) and w2.shape == (D_FF, D_MODEL)
    M = B * S

    # Big row tile for MXU utilization; clamp to the (8-aligned) problem size so
    # tiny demo inputs don't over-pad, then pad rows up to a tile multiple.
    tm_eff = min(tm, _round_up(M, 8))
    M_pad = _round_up(M, tm_eff)

    x2 = x.reshape(M, D)
    if M_pad != M:
        x2 = jnp.pad(x2, ((0, M_pad - M), (0, 0)))

    grid = (M_pad // tm_eff,)

    x_bytes = jnp.dtype(x.dtype).itemsize
    cost = pl.CostEstimate(
        flops=2 * 2 * M_pad * D_MODEL * D_FF,          # two matmuls
        transcendentals=M_pad,                          # one rsqrt per row
        bytes_accessed=(2 * M_pad * D) * x_bytes
        + w1.size * jnp.dtype(w1.dtype).itemsize
        + w2.size * jnp.dtype(w2.dtype).itemsize,
    )

    out = pl.pallas_call(
        ffn_ln_kernel,
        out_shape=jax.ShapeDtypeStruct((M_pad, D), x.dtype),
        grid_spec=pltpu.PrefetchScalarGridSpec(
            num_scalar_prefetch=0,
            grid=grid,
            in_specs=[
                pl.BlockSpec((tm_eff, D), lambda i: (i, 0)),        # row tile of x
                pl.BlockSpec(memory_space=pltpu.MemorySpace.VMEM),  # W1: single resident copy
                pl.BlockSpec(memory_space=pltpu.MemorySpace.VMEM),  # W2: single resident copy
            ],
            out_specs=pl.BlockSpec((tm_eff, D), lambda i: (i, 0)),
        ),
        compiler_params=pltpu.CompilerParams(
            dimension_semantics=("parallel",),       # shards rows across TCs on v7x
            vmem_limit_bytes=48 * 1024 * 1024,       # explicit budget; safe on v5e/v6e/v7x
        ),
        cost_estimate=cost,
    )(x2, w1, w2)

    if M_pad != M:
        out = out[:M]
    return out.reshape(B, S, D)


def reference(x, w1, w2):
    x32 = x.astype(jnp.float32)
    h = jnp.maximum(x32 @ w1.astype(jnp.float32), 0.0)
    y = h @ w2.astype(jnp.float32) + x32
    mean = jnp.mean(y, axis=-1, keepdims=True)
    var = jnp.mean((y - mean) ** 2, axis=-1, keepdims=True)
    return ((y - mean) * jax.lax.rsqrt(var + LN_EPS)).astype(x.dtype)


if __name__ == "__main__":
    key = jax.random.PRNGKey(0)
    kx, k1, k2 = jax.random.split(key, 3)

    batch, seq = 2, 8
    x = jax.random.normal(kx, (batch, seq, D_MODEL), dtype=jnp.float32)
    # Deterministic synthetic weights (scaled like a typical Linear init).
    w1 = jax.random.normal(k1, (D_MODEL, D_FF), dtype=jnp.float32) * (1.0 / D_MODEL ** 0.5)
    w2 = jax.random.normal(k2, (D_FF, D_MODEL), dtype=jnp.float32) * (1.0 / D_FF ** 0.5)

    out = poswise_feed_forward(x, w1, w2)
    out = jax.block_until_ready(out)

    ref = reference(x, w1, w2)
    assert out.shape == (batch, seq, D_MODEL)
    assert jnp.allclose(out, ref, atol=1e-4, rtol=1e-4)

    print("KERNEL_OK")
</pallas_src>

<mosaic_0001>
module attributes {stable_mosaic.version = 11 : i64} {
  func.func @ffn_ln_kernel(%arg0: i32, %arg1: memref<16x128xf32, #tpu.memory_space<vmem>>, %arg2: memref<128x512xf32, #tpu.memory_space<vmem>>, %arg3: memref<512x128xf32, #tpu.memory_space<vmem>>, %arg4: memref<16x128xf32, #tpu.memory_space<vmem>>) attributes {dimension_semantics = [#tpu.dimension_semantics<parallel>], iteration_bounds = array<i64: 1>, scalar_prefetch = 0 : i64, scratch_operands = 0 : i64, tpu.core_type = #tpu.core_type<tc>, window_params = [{transform_indices = @transform_0, window_bounds = array<i64: 16, 128>}, {pipeline_mode = #tpu.pipeline_mode<synchronous>, transform_indices = @transform_1, window_bounds = array<i64: 128, 512>}, {pipeline_mode = #tpu.pipeline_mode<synchronous>, transform_indices = @transform_2, window_bounds = array<i64: 512, 128>}, {transform_indices = @transform_3, window_bounds = array<i64: 16, 128>}]} {
    %c0 = arith.constant 0 : index
    %c0_0 = arith.constant 0 : index
    %0 = vector.load %arg1[%c0, %c0_0] : memref<16x128xf32, #tpu.memory_space<vmem>>, vector<16x128xf32>
    %c0_1 = arith.constant 0 : index
    %c0_2 = arith.constant 0 : index
    %1 = vector.load %arg2[%c0_1, %c0_2] : memref<128x512xf32, #tpu.memory_space<vmem>>, vector<128x512xf32>
    %cst = arith.constant dense<0.000000e+00> : vector<16x512xf32>
    %2 = tpu.matmul %0, %1, %cst {dimension_numbers = #tpu.dot_dimension_numbers<[1], [0], [0], [1], [0, 0, 1, 1], [], []>} : vector<16x128xf32>, vector<128x512xf32>, vector<16x512xf32> -> vector<16x512xf32>
    %cst_3 = arith.constant 0.000000e+00 : f32
    %3 = vector.broadcast %cst_3 : f32 to vector<16x512xf32>
    %4 = arith.maximumf %2, %3 : vector<16x512xf32>
    %c0_4 = arith.constant 0 : index
    %c0_5 = arith.constant 0 : index
    %5 = vector.load %arg3[%c0_4, %c0_5] : memref<512x128xf32, #tpu.memory_space<vmem>>, vector<512x128xf32>
    %cst_6 = arith.constant dense<0.000000e+00> : vector<16x128xf32>
    %6 = tpu.matmul %4, %5, %cst_6 {dimension_numbers = #tpu.dot_dimension_numbers<[1], [0], [0], [1], [0, 0, 1, 1], [], []>} : vector<16x512xf32>, vector<512x128xf32>, vector<16x128xf32> -> vector<16x128xf32>
    %7 = arith.addf %6, %0 : vector<16x128xf32>
    %cst_7 = arith.constant dense<0.000000e+00> : vector<16xf32>
    %8 = vector.multi_reduction <add>, %7, %cst_7 [1] : vector<16x128xf32> to vector<16xf32>
    %9 = vector.shape_cast %8 : vector<16xf32> to vector<16x1xf32>
    %cst_8 = arith.constant 1.280000e+02 : f32
    %10 = vector.broadcast %cst_8 : f32 to vector<16x1xf32>
    %11 = arith.divf %9, %10 : vector<16x1xf32>
    %12 = vector.broadcast %11 : vector<16x1xf32> to vector<16x128xf32>
    %13 = arith.subf %7, %12 : vector<16x128xf32>
    %14 = arith.mulf %13, %13 : vector<16x128xf32>
    %cst_9 = arith.constant dense<0.000000e+00> : vector<16xf32>
    %15 = vector.multi_reduction <add>, %14, %cst_9 [1] : vector<16x128xf32> to vector<16xf32>
    %16 = vector.shape_cast %15 : vector<16xf32> to vector<16x1xf32>
    %cst_10 = arith.constant 1.280000e+02 : f32
    %17 = vector.broadcast %cst_10 : f32 to vector<16x1xf32>
    %18 = arith.divf %16, %17 : vector<16x1xf32>
    %cst_11 = arith.constant 9.99999974E-6 : f32
    %19 = vector.broadcast %cst_11 : f32 to vector<16x1xf32>
    %20 = arith.addf %18, %19 : vector<16x1xf32>
    %21 = math.rsqrt %20 : vector<16x1xf32>
    %22 = vector.broadcast %21 : vector<16x1xf32> to vector<16x128xf32>
    %23 = arith.mulf %13, %22 : vector<16x128xf32>
    %c0_12 = arith.constant 0 : index
    %c0_13 = arith.constant 0 : index
    %24 = vector.load %arg4[%c0_12, %c0_13] : memref<16x128xf32, #tpu.memory_space<vmem>>, vector<16x128xf32>
    tpu.vector_store %arg4[%c0_12, %c0_13], %23 {strides = array<i32>} : memref<16x128xf32, #tpu.memory_space<vmem>>, vector<16x128xf32>,
    return
  }
  func.func @transform_0(%arg0: i32) -> (i32, i32) {
    %c0_i32 = arith.constant 0 : i32
    %c0_i32_0 = arith.constant 0 : i32
    return %arg0, %c0_i32 : i32, i32
  }
  func.func @transform_1(%arg0: i32) -> (i32, i32) {
    %c0_i32 = arith.constant 0 : i32
    %c0_i32_0 = arith.constant 0 : i32
    %c0_i32_1 = arith.constant 0 : i32
    return %c0_i32, %c0_i32_0 : i32, i32
  }
  func.func @transform_2(%arg0: i32) -> (i32, i32) {
    %c0_i32 = arith.constant 0 : i32
    %c0_i32_0 = arith.constant 0 : i32
    %c0_i32_1 = arith.constant 0 : i32
    return %c0_i32, %c0_i32_0 : i32, i32
  }
  func.func @transform_3(%arg0: i32) -> (i32, i32) {
    %c0_i32 = arith.constant 0 : i32
    %c0_i32_0 = arith.constant 0 : i32
    return %arg0, %c0_i32 : i32, i32
  }
}

</mosaic_0001>

<bundles_post_ra>
// kernel: tpu_custom_call.1
= control target key start
LH: loop header
LB: loop body
LE: loop exit
PB: predicated region body
PF: predicated region fallthrough
CT: control target
= control target key end

     0   :  { %8 = vsyncpa [#allocation3], 0  ;;  %s952_s0 = inlined_call_operand.hbm [shape: f32[16,128], index: 0, kind: input, shape index: {}]   ;;  %s953_s1 = inlined_call_operand.hbm [shape: f32[128,512], index: 1, kind: input, shape index: {}]   ;;  %s954_s2 = inlined_call_operand.hbm [shape: f32[512,128], index: 2, kind: input, shape index: {}]   ;;  %s955_s3 = inlined_call_operand.hbm [shape: f32[16,128], index: 3, kind: output, shape index: {}]  }
   0x1   :  { %9 = vsyncpa [#allocation6], 0 }
   0x2   :  { %10 = vsyncpa [#allocation4], 0  ;;  %s852_s12 = smov [#allocation5]   ;;  %s758_s16 = scalar_lea.hbm %s953_s1, 8192 }
   0x3   :  { %s28_s13 = sshll.u32 %s852_s12, 4  ;;  %p759_p0 = scmp.ne.s32.totalorder %s953_s1, %s758_s16  ;;  %s29_s13 = int_to_ptr.vmem [resolvable:$true] %s28_s13 }
   0x4   :  { %p762_p1 = scmp.lt.u32.totalorder %s758_s16, %s953_s1 }
   0x6   :  { %p764_p2 = pnand %p762_p1, %p759_p0 }
   0x8   :  { %767 = shalt.err (!%p764_p2)
}
   0x9   :  { %s768_s21 = scalar_lea.vmem %s29_s13, 8192  ;;  %p773_p4 = scmp.lt.s32.totalorder %s29_s13, %s29_s13 }
   0xa   :  { %p769_p3 = scmp.ne.s32.totalorder %s29_s13, %s768_s21  ;;  %p774_p5 = scmp.lt.s32.totalorder %s768_s21, %s768_s21 }
   0xc   :  { %p775_p6 = por %p774_p5, %p773_p4 }
   0xe   :  { %p776_p7 = pnand %p775_p6, %p769_p3 }
  0x10   :  { %779 = shalt.err (!%p776_p7)
}
  0x11   :  { %s853_s22 = smov 512   ;;  %s854_s23 = smov 32  }
  0x12   :  { %34 = dma.hbm_to_vmem [thread:$0]  %s953_s1, 8192, %s29_s13, [#allocation6], %s853_s22, %s853_s22, %s854_s23  }
  0x13   :  { %s855_s26 = smov [#allocation2]   ;;  %s780_s30 = scalar_lea.hbm %s952_s0, 256 }
  0x14   :  { %s16_s27 = sshll.u32 %s855_s26, 4  ;;  %p781_p8 = scmp.ne.s32.totalorder %s952_s0, %s780_s30  ;;  %s17_s27 = int_to_ptr.vmem [resolvable:$true] %s16_s27 }
  0x15   :  { %p784_p9 = scmp.lt.u32.totalorder %s780_s30, %s952_s0 }
  0x17   :  { %p786_p10 = pnand %p784_p9, %p781_p8 }
  0x19   :  { %789 = shalt.err (!%p786_p10)
}
  0x1a   :  { %s790_s8 = scalar_lea.vmem %s17_s27, 256  ;;  %p795_p12 = scmp.lt.s32.totalorder %s17_s27, %s17_s27 }
  0x1b   :  { %p791_p11 = scmp.ne.s32.totalorder %s17_s27, %s790_s8  ;;  %p796_p13 = scmp.lt.s32.totalorder %s790_s8, %s790_s8 }
  0x1d   :  { %p797_p0 = por %p796_p13, %p795_p12 }
  0x1f   :  { %p798_p1 = pnand %p797_p0, %p791_p11 }
  0x21   :  { %801 = shalt.err (!%p798_p1)
}
  0x22   :  { %s856_s1 = smov 128   ;;  %s857_s9 = smov 8  }
  0x23   :  { %22 = dma.hbm_to_vmem [thread:$0]  %s952_s0, 256, %s17_s27, [#allocation3], %s856_s1, %s856_s1, %s857_s9  }
  0x24   :  { %s858_s12 = smov [#allocation7]   ;;  %s802_s16 = scalar_lea.hbm %s954_s2, 8192 }
  0x25   :  { %s40_s13 = sshll.u32 %s858_s12, 4  ;;  %p803_p2 = scmp.ne.s32.totalorder %s954_s2, %s802_s16  ;;  %s41_s13 = int_to_ptr.vmem [resolvable:$true] %s40_s13 }
  0x26   :  { %p806_p3 = scmp.lt.u32.totalorder %s802_s16, %s954_s2 }
  0x28   :  { %p808_p4 = pnand %p806_p3, %p803_p2 }
  0x2a   :  { %811 = shalt.err (!%p808_p4)
}
  0x2b   :  { %s812_s21 = scalar_lea.vmem %s41_s13, 8192  ;;  %p817_p6 = scmp.lt.s32.totalorder %s41_s13, %s41_s13 }
  0x2c   :  { %p813_p5 = scmp.ne.s32.totalorder %s41_s13, %s812_s21  ;;  %p818_p7 = scmp.lt.s32.totalorder %s812_s21, %s812_s21 }
  0x2e   :  { %p819_p8 = por %p818_p7, %p817_p6 }
  0x30   :  { %p820_p9 = pnand %p819_p8, %p813_p5 }
  0x32   :  { %823 = shalt.err (!%p820_p9)
}
  0x33   :  { %46 = dma.hbm_to_vmem [thread:$0]  %s954_s2, 8192, %s41_s13, [#allocation6], %s856_s1, %s856_s1, %s857_s9  }
  0x34   :  { %846 = dma.done.wait [#allocation3], 256  }
  0x35   :  { %847 = vsyncadd [#allocation3], 4294967040 }
  0x36   :  { %848 = dma.done.wait [#allocation6], 16384  }
  0x37   :  { %849 = vsyncadd [#allocation6], 4294950912  ;;  %v859_v0 = vmov 0.0   ;;  %v59_v1 = vld [vmem:[#allocation5 + $0x8] sm:$0xff]  ;;  %v61_v3 = vld [vmem:[#allocation5 + $0x18] sm:$0xff]  ;;  %s860_s2 = smov [#allocation8]  }
  0x38   :  { %186 = vmatprep.mubr.f32.mxu0 %v859_v0  ;;  %263 = vmatprep.mubr.f32.mxu1 %v859_v0  ;;  %v63_v2 = vld [vmem:[#allocation5 + $0x28] sm:$0xff]  ;;  %v65_v5 = vld [vmem:[#allocation5 + $0x38] sm:$0xff]  ;;  %v58_v6 = vld [vmem:[#allocation5] sm:$0xff]  ;;  %s528_s23 = sshll.u32 %s860_s2, 4  ;;  %s529_s23 = int_to_ptr.vmem [resolvable:$true] %s528_s23 }
  0x39   :  { %v617_v4 = vpack.c.bf16 %v63_v2, %v59_v1  ;;  %v62_v7 = vld [vmem:[#allocation5 + $0x20] sm:$0xff]  ;;  %v649_v8 = vpack.c.bf16 %v65_v5, %v61_v3  ;;  %v60_v10 = vld [vmem:[#allocation5 + $0x10] sm:$0xff]  ;;  %v67_v12 = vld [vmem:[#allocation5 + $0x48] sm:$0xff]  ;;  %s824_s24 = scalar_lea.vmem %s529_s23, 256  ;;  %p829_p11 = scmp.lt.s32.totalorder %s529_s23, %s529_s23 }
  0x3a   :  { %v619_v9 = vpack.c.bf16 %v62_v7, %v58_v6  ;;  %v64_v11 = vld [vmem:[#allocation5 + $0x30] sm:$0xff]  ;;  %v71_v14 = vld [vmem:[#allocation5 + $0x68] sm:$0xff]  ;;  %v69_v15 = vld [vmem:[#allocation5 + $0x58] sm:$0xff]  ;;  %p825_p10 = scmp.ne.s32.totalorder %s529_s23, %s824_s24  ;;  %p830_p12 = scmp.lt.s32.totalorder %s824_s24, %s824_s24 }
  0x3b   :  { %618 = vmatprep.subr.bf16.mxu0 %v617_v4  ;;  %v651_v13 = vpack.c.bf16 %v64_v11, %v60_v10  ;;  %v73_v16 = vld [vmem:[#allocation5 + $0x78] sm:$0xff]  ;;  %650 = vmatprep.subr.bf16.mxu1 %v649_v8  ;;  %v621_v17 = vpack.c.bf16 %v71_v14, %v67_v12  ;;  %v66_v19 = vld [vmem:[#allocation5 + $0x40] sm:$0xff]  ;;  %v68_v21 = vld [vmem:[#allocation5 + $0x50] sm:$0xff] }
  0x3c   :  { %620 = vmatpush1.bf16.msra.mxu0 %v619_v9  ;;  %v653_v18 = vpack.c.bf16 %v73_v16, %v69_v15  ;;  %v70_v20 = vld [vmem:[#allocation5 + $0x60] sm:$0xff]  ;;  %v72_v23 = vld [vmem:[#allocation5 + $0x70] sm:$0xff]  ;;  %v75_v24 = vld [vmem:[#allocation5 + $0x88] sm:$0xff]  ;;  %p831_p13 = por %p830_p12, %p829_p11 }
  0x3d   :  { %652 = vmatpush1.bf16.msra.mxu1 %v651_v13  ;;  %v623_v22 = vpack.c.bf16 %v70_v20, %v66_v19  ;;  %v79_v25 = vld [vmem:[#allocation5 + $0xa8] sm:$0xff]  ;;  %622 = vmatprep.subr.bf16.mxu0 %v621_v17  ;;  %v655_v26 = vpack.c.bf16 %v72_v23, %v68_v21  ;;  %v77_v28 = vld [vmem:[#allocation5 + $0x98] sm:$0xff]  ;;  %v74_v30 = vld [vmem:[#allocation5 + $0x80] sm:$0xff] }
  0x3e   :  { %654 = vmatprep.subr.bf16.mxu1 %v653_v18  ;;  %v625_v27 = vpack.c.bf16 %v79_v25, %v75_v24  ;;  %v81_v29 = vld [vmem:[#allocation5 + $0xb8] sm:$0xff]  ;;  %v78_v32 = vld [vmem:[#allocation5 + $0xa0] sm:$0xff]  ;;  %v76_v33 = vld [vmem:[#allocation5 + $0x90] sm:$0xff]  ;;  %p832_p0 = pnand %p831_p13, %p825_p10 }
  0x3f   :  { %v657_v31 = vpack.c.bf16 %v81_v29, %v77_v28  ;;  %v80_v34 = vld [vmem:[#allocation5 + $0xb0] sm:$0xff]  ;;  %v627_v35 = vpack.c.bf16 %v78_v32, %v74_v30  ;;  %v83_v36 = vld [vmem:[#allocation5 + $0xc8] sm:$0xff]  ;;  %v85_v38 = vld [vmem:[#allocation5 + $0xd8] sm:$0xff] }
  0x40   :  { %624 = vmatpush1.bf16.msra.mxu0 %v623_v22  ;;  %v87_v37 = vld [vmem:[#allocation5 + $0xe8] sm:$0xff]  ;;  %v659_v39 = vpack.c.bf16 %v80_v34, %v76_v33  ;;  %v89_v41 = vld [vmem:[#allocation5 + $0xf8] sm:$0xff]  ;;  %v82_v42 = vld [vmem:[#allocation5 + $0xc0] sm:$0xff] }
  0x41   :  { %656 = vmatpush1.bf16.msra.mxu1 %v655_v26  ;;  %626 = vmatprep.subr.bf16.mxu0 %v625_v27  ;;  %v629_v40 = vpack.c.bf16 %v87_v37, %v83_v36  ;;  %v86_v43 = vld [vmem:[#allocation5 + $0xe0] sm:$0xff]  ;;  %v661_v44 = vpack.c.bf16 %v89_v41, %v85_v38  ;;  %v84_v45 = vld [vmem:[#allocation5 + $0xd0] sm:$0xff]  ;;  %v91_v47 = vld [vmem:[#allocation5 + $0x108] sm:$0xff] }
  0x42   :  { %658 = vmatprep.subr.bf16.mxu1 %v657_v31  ;;  %v88_v46 = vld [vmem:[#allocation5 + $0xf0] sm:$0xff]  ;;  %v95_v48 = vld [vmem:[#allocation5 + $0x128] sm:$0xff]  ;;  %v93_v49 = vld [vmem:[#allocation5 + $0x118] sm:$0xff]  ;;  %v631_v51 = vpack.c.bf16 %v86_v43, %v82_v42 }
  0x43   :  { %v97_v50 = vld [vmem:[#allocation5 + $0x138] sm:$0xff]  ;;  %v663_v52 = vpack.c.bf16 %v88_v46, %v84_v45  ;;  %v633_v53 = vpack.c.bf16 %v95_v48, %v91_v47  ;;  %v90_v54 = vld [vmem:[#allocation5 + $0x100] sm:$0xff]  ;;  %v92_v56 = vld [vmem:[#allocation5 + $0x110] sm:$0xff] }
  0x44   :  { %628 = vmatpush1.bf16.msra.mxu0 %v627_v35  ;;  %v94_v55 = vld [vmem:[#allocation5 + $0x120] sm:$0xff]  ;;  %v665_v57 = vpack.c.bf16 %v97_v50, %v93_v49  ;;  %v96_v58 = vld [vmem:[#allocation5 + $0x130] sm:$0xff]  ;;  %v99_v59 = vld [vmem:[#allocation5 + $0x148] sm:$0xff] }
  0x45   :  { %660 = vmatpush1.bf16.msra.mxu1 %v659_v39  ;;  %630 = vmatprep.subr.bf16.mxu0 %v629_v40  ;;  %v103_v60 = vld [vmem:[#allocation5 + $0x168] sm:$0xff]  ;;  %v101_v61 = vld [vmem:[#allocation5 + $0x158] sm:$0xff]  ;;  %v635_v63 = vpack.c.bf16 %v94_v55, %v90_v54  ;;  %v667_v1 = vpack.c.bf16 %v96_v58, %v92_v56  ;;  %v98_v3 = vld [vmem:[#allocation5 + $0x140] sm:$0xff] }
  0x46   :  { %662 = vmatprep.subr.bf16.mxu1 %v661_v44  ;;  %v105_v62 = vld [vmem:[#allocation5 + $0x178] sm:$0xff]  ;;  %v637_v2 = vpack.c.bf16 %v103_v60, %v99_v59  ;;  %v102_v4 = vld [vmem:[#allocation5 + $0x160] sm:$0xff]  ;;  %v100_v5 = vld [vmem:[#allocation5 + $0x150] sm:$0xff] }
  0x47   :  { %v669_v6 = vpack.c.bf16 %v105_v62, %v101_v61  ;;  %v104_v7 = vld [vmem:[#allocation5 + $0x170] sm:$0xff]  ;;  %v107_v8 = vld [vmem:[#allocation5 + $0x188] sm:$0xff]  ;;  %v109_v10 = vld [vmem:[#allocation5 + $0x198] sm:$0xff]  ;;  %v639_v12 = vpack.c.bf16 %v102_v4, %v98_v3 }
  0x48   :  { %632 = vmatpush1.bf16.msra.mxu0 %v631_v51  ;;  %v111_v9 = vld [vmem:[#allocation5 + $0x1a8] sm:$0xff]  ;;  %v113_v11 = vld [vmem:[#allocation5 + $0x1b8] sm:$0xff]  ;;  %v671_v13 = vpack.c.bf16 %v104_v7, %v100_v5  ;;  %v106_v15 = vld [vmem:[#allocation5 + $0x180] sm:$0xff] }
  0x49   :  { %664 = vmatpush1.bf16.msra.mxu1 %v663_v52  ;;  %634 = vmatprep.subr.bf16.mxu0 %v633_v53  ;;  %v641_v14 = vpack.c.bf16 %v111_v9, %v107_v8  ;;  %v110_v16 = vld [vmem:[#allocation5 + $0x1a0] sm:$0xff]  ;;  %v108_v17 = vld [vmem:[#allocation5 + $0x190] sm:$0xff]  ;;  %v673_v18 = vpack.c.bf16 %v113_v11, %v109_v10  ;;  %v115_v20 = vld [vmem:[#allocation5 + $0x1c8] sm:$0xff] }
  0x4a   :  { %666 = vmatprep.subr.bf16.mxu1 %v665_v57  ;;  %v112_v19 = vld [vmem:[#allocation5 + $0x1b0] sm:$0xff]  ;;  %v119_v21 = vld [vmem:[#allocation5 + $0x1e8] sm:$0xff]  ;;  %v117_v22 = vld [vmem:[#allocation5 + $0x1d8] sm:$0xff]  ;;  %v643_v24 = vpack.c.bf16 %v110_v16, %v106_v15 }
  0x4b   :  { %v121_v23 = vld [vmem:[#allocation5 + $0x1f8] sm:$0xff]  ;;  %v675_v25 = vpack.c.bf16 %v112_v19, %v108_v17  ;;  %v645_v26 = vpack.c.bf16 %v119_v21, %v115_v20  ;;  %v114_v27 = vld [vmem:[#allocation5 + $0x1c0] sm:$0xff]  ;;  %v116_v29 = vld [vmem:[#allocation5 + $0x1d0] sm:$0xff] }
  0x4c   :  { %636 = vmatpush1.bf16.msra.mxu0 %v635_v63  ;;  %v118_v28 = vld [vmem:[#allocation5 + $0x1e0] sm:$0xff]  ;;  %v677_v30 = vpack.c.bf16 %v121_v23, %v117_v22  ;;  %v120_v31 = vld [vmem:[#allocation5 + $0x1f0] sm:$0xff]  ;;  %v301_v33 = vld [vmem:[#allocation7 + $0x88] sm:$0xff] }
  0x4d   :  { %668 = vmatpush1.bf16.msra.mxu1 %v667_v1  ;;  %638 = vmatprep.subr.bf16.mxu0 %v637_v2  ;;  %v300_v32 = vld [vmem:[#allocation7 + $0x80] sm:$0xff]  ;;  %v333_v35 = vld [vmem:[#allocation7 + $0x188] sm:$0xff]  ;;  %v647_v36 = vpack.c.bf16 %v118_v28, %v114_v27  ;;  %v679_v37 = vpack.c.bf16 %v120_v31, %v116_v29  ;;  %v302_v44 = vld [vmem:[#allocation7 + $0x90] sm:$0xff] }
  0x4e   :  { %670 = vmatprep.subr.bf16.mxu1 %v669_v6  ;;  %v332_v34 = vld [vmem:[#allocation7 + $0x180] sm:$0xff]  ;;  %v681_v38 = vpack.c.bf16 %v301_v33, %v300_v32  ;;  %v285_v41 = vld [vmem:[#allocation7 + $0x8] sm:$0xff]  ;;  %v303_v45 = vld [vmem:[#allocation7 + $0x98] sm:$0xff] }
  0x4f   :  { %v713_v39 = vpack.c.bf16 %v333_v35, %v332_v34  ;;  %v284_v40 = vld [vmem:[#allocation7] sm:$0xff]  ;;  %v317_v43 = vld [vmem:[#allocation7 + $0x108] sm:$0xff]  ;;  %v925_v46 = vld [vmem:[#allocation2] sm:$0xff]  ;;  %v685_v51 = vpack.c.bf16 %v303_v45, %v302_v44 }
  0x50   :  { %640 = vmatpush1.bf16.msra.mxu0 %v639_v12  ;;  %v316_v42 = vld [vmem:[#allocation7 + $0x100] sm:$0xff]  ;;  %v334_v47 = vld [vmem:[#allocation7 + $0x190] sm:$0xff]  ;;  %v335_v48 = vld [vmem:[#allocation7 + $0x198] sm:$0xff]  ;;  %v683_v49 = vpack.c.bf16 %v285_v41, %v284_v40 }
  0x51   :  { %672 = vmatpush1.bf16.msra.mxu1 %v671_v13  ;;  %642 = vmatprep.subr.bf16.mxu0 %v641_v14  ;;  %v715_v50 = vpack.c.bf16 %v317_v43, %v316_v42  ;;  %v286_v52 = vld [vmem:[#allocation7 + $0x10] sm:$0xff]  ;;  %v287_v53 = vld [vmem:[#allocation7 + $0x18] sm:$0xff]  ;;  %v717_v55 = vpack.c.bf16 %v335_v48, %v334_v47  ;;  %v304_v57 = vld [vmem:[#allocation7 + $0xa0] sm:$0xff] }
  0x52   :  { %674 = vmatprep.subr.bf16.mxu1 %v673_v18  ;;  %v318_v54 = vld [vmem:[#allocation7 + $0x110] sm:$0xff]  ;;  %v319_v56 = vld [vmem:[#allocation7 + $0x118] sm:$0xff]  ;;  %v305_v58 = vld [vmem:[#allocation7 + $0xa8] sm:$0xff]  ;;  %v687_v62 = vpack.c.bf16 %v287_v53, %v286_v52 }
  0x53   :  { %v930_v59 = vld [vmem:[#allocation2 + $0x8] sm:$0xff]  ;;  %v336_v60 = vld [vmem:[#allocation7 + $0x1a0] sm:$0xff]  ;;  %v337_v61 = vld [vmem:[#allocation7 + $0x1a8] sm:$0xff]  ;;  %v719_v63 = vpack.c.bf16 %v319_v56, %v318_v54  ;;  %v689_v1 = vpack.c.bf16 %v305_v58, %v304_v57 }
  0x54   :  { %644 = vmatpush1.bf16.msra.mxu0 %v643_v24  ;;  %v288_v2 = vld [vmem:[#allocation7 + $0x20] sm:$0xff]  ;;  %v289_v3 = vld [vmem:[#allocation7 + $0x28] sm:$0xff]  ;;  %v721_v5 = vpack.c.bf16 %v337_v61, %v336_v60  ;;  %v306_v7 = vld [vmem:[#allocation7 + $0xb0] sm:$0xff] }
  0x55   :  { %676 = vmatpush1.bf16.msra.mxu1 %v675_v25  ;;  %646 = vmatprep.subr.bf16.mxu0 %v645_v26  ;;  %v320_v4 = vld [vmem:[#allocation7 + $0x120] sm:$0xff]  ;;  %v321_v6 = vld [vmem:[#allocation7 + $0x128] sm:$0xff]  ;;  %v307_v8 = vld [vmem:[#allocation7 + $0xb8] sm:$0xff]  ;;  %v691_v10 = vpack.c.bf16 %v289_v3, %v288_v2 }
  0x56   :  { %678 = vmatprep.subr.bf16.mxu1 %v677_v30  ;;  %v338_v9 = vld [vmem:[#allocation7 + $0x1b0] sm:$0xff]  ;;  %v723_v11 = vpack.c.bf16 %v321_v6, %v320_v4  ;;  %v693_v12 = vpack.c.bf16 %v307_v8, %v306_v7  ;;  %v291_v14 = vld [vmem:[#allocation7 + $0x38] sm:$0xff]  ;;  %v308_v18 = vld [vmem:[#allocation7 + $0xc0] sm:$0xff] }
  0x57   :  { %v290_v13 = vld [vmem:[#allocation7 + $0x30] sm:$0xff]  ;;  %v323_v17 = vld [vmem:[#allocation7 + $0x138] sm:$0xff]  ;;  %v309_v19 = vld [vmem:[#allocation7 + $0xc8] sm:$0xff] }
  0x58   :  { %648 = vmatpush1.bf16.msra.mxu0 %v647_v36  ;;  %v322_v15 = vld [vmem:[#allocation7 + $0x130] sm:$0xff]  ;;  %v340_v20 = vld [vmem:[#allocation7 + $0x1c0] sm:$0xff]  ;;  %v341_v21 = vld [vmem:[#allocation7 + $0x1c8] sm:$0xff]  ;;  %v695_v22 = vpack.c.bf16 %v291_v14, %v290_v13  ;;  %v697_v24 = vpack.c.bf16 %v309_v19, %v308_v18 }
  0x59   :  { %680 = vmatpush1.bf16.msra.mxu1 %v679_v37  ;;  %682 = vmatprep.subr.bf16.mxu0 %v681_v38  ;;  %v727_v23 = vpack.c.bf16 %v323_v17, %v322_v15  ;;  %v292_v25 = vld [vmem:[#allocation7 + $0x40] sm:$0xff]  ;;  %v293_v26 = vld [vmem:[#allocation7 + $0x48] sm:$0xff]  ;;  %v729_v28 = vpack.c.bf16 %v341_v21, %v340_v20  ;;  %v310_v30 = vld [vmem:[#allocation7 + $0xd0] sm:$0xff] }
  0x5a   :  { %714 = vmatprep.subr.bf16.mxu1 %v713_v39  ;;  %v324_v27 = vld [vmem:[#allocation7 + $0x140] sm:$0xff]  ;;  %v325_v29 = vld [vmem:[#allocation7 + $0x148] sm:$0xff]  ;;  %v311_v31 = vld [vmem:[#allocation7 + $0xd8] sm:$0xff]  ;;  %v699_v34 = vpack.c.bf16 %v293_v26, %v292_v25 }
  0x5b   :  { %187 = vmatmul.mubr.f32.vlgmr.msra.gmra.mrb[0].mxu0 %v925_v46  ;;  %v342_v32 = vld [vmem:[#allocation7 + $0x1d0] sm:$0xff]  ;;  %v343_v33 = vld [vmem:[#allocation7 + $0x1d8] sm:$0xff]  ;;  %v731_v35 = vpack.c.bf16 %v325_v29, %v324_v27  ;;  %v701_v36 = vpack.c.bf16 %v311_v31, %v310_v30  ;;  %v312_v42 = vld [vmem:[#allocation7 + $0xe0] sm:$0xff] }
  0x5c   :  { %264 = vmatmul.mubr.f32.vlgmr.msra.gmra.mrb[0].mxu1 %v925_v46  ;;  %192 = vmatprep.mubr.f32.mxu0 %v859_v0  ;;  %v294_v37 = vld [vmem:[#allocation7 + $0x50] sm:$0xff]  ;;  %v295_v38 = vld [vmem:[#allocation7 + $0x58] sm:$0xff]  ;;  %v733_v40 = vpack.c.bf16 %v343_v33, %v342_v32  ;;  %v313_v43 = vld [vmem:[#allocation7 + $0xe8] sm:$0xff] }
  0x5d   :  { %269 = vmatprep.mubr.f32.mxu1 %v859_v0  ;;  %684 = vmatpush3.bf16.msra.mxu0 %v683_v49  ;;  %v339_v0 = vld [vmem:[#allocation7 + $0x1b8] sm:$0xff]  ;;  %v326_v39 = vld [vmem:[#allocation7 + $0x150] sm:$0xff]  ;;  %v344_v44 = vld [vmem:[#allocation7 + $0x1e0] sm:$0xff]  ;;  %v703_v47 = vpack.c.bf16 %v295_v38, %v294_v37  ;;  %v705_v49 = vpack.c.bf16 %v313_v43, %v312_v42 }
  0x5e   :  { %716 = vmatpush3.bf16.msra.mxu1 %v715_v50  ;;  %686 = vmatprep.subr.bf16.mxu0 %v685_v51  ;;  %v725_v16 = vpack.c.bf16 %v339_v0, %v338_v9  ;;  %v327_v41 = vld [vmem:[#allocation7 + $0x158] sm:$0xff]  ;;  %v345_v45 = vld [vmem:[#allocation7 + $0x1e8] sm:$0xff]  ;;  %v296_v50 = vld [vmem:[#allocation7 + $0x60] sm:$0xff] }
  0x5f   :  { %193 = vmatmul.mubr.f32.gmra.mrb[2].mxu0 %v930_v59  ;;  %718 = vmatprep.subr.bf16.mxu1 %v717_v55  ;;  %v735_v48 = vpack.c.bf16 %v327_v41, %v326_v39  ;;  %v297_v51 = vld [vmem:[#allocation7 + $0x68] sm:$0xff]  ;;  %v737_v52 = vpack.c.bf16 %v345_v45, %v344_v44  ;;  %v328_v53 = vld [vmem:[#allocation7 + $0x160] sm:$0xff]  ;;  %v314_v57 = vld [vmem:[#allocation7 + $0xf0] sm:$0xff] }
  0x60   :  { %270 = vmatmul.mubr.f32.gmra.mrb[2].mxu1 %v930_v59  ;;  %v329_v54 = vld [vmem:[#allocation7 + $0x168] sm:$0xff]  ;;  %v707_v55 = vpack.c.bf16 %v297_v51, %v296_v50  ;;  %v315_v58 = vld [vmem:[#allocation7 + $0xf8] sm:$0xff]  ;;  %v346_v60 = vld [vmem:[#allocation7 + $0x1f0] sm:$0xff] }
  0x61   :  { %688 = vmatpush3.bf16.msra.mxu0 %v687_v62  ;;  %v739_v56 = vpack.c.bf16 %v329_v54, %v328_v53  ;;  %v709_v61 = vpack.c.bf16 %v315_v58, %v314_v57  ;;  %v347_v62 = vld [vmem:[#allocation7 + $0x1f8] sm:$0xff]  ;;  %v330_v4 = vld [vmem:[#allocation7 + $0x170] sm:$0xff] }
  0x62   :  { %720 = vmatpush3.bf16.msra.mxu1 %v719_v63  ;;  %690 = vmatprep.subr.bf16.mxu0 %v689_v1  ;;  %v298_v63 = vld [vmem:[#allocation7 + $0x70] sm:$0xff]  ;;  %v299_v1 = vld [vmem:[#allocation7 + $0x78] sm:$0xff]  ;;  %v741_v2 = vpack.c.bf16 %v347_v62, %v346_v60 }
  0x63   :  { %722 = vmatprep.subr.bf16.mxu1 %v721_v5  ;;  %v711_v3 = vpack.c.bf16 %v299_v1, %v298_v63  ;;  %v331_v5 = vld [vmem:[#allocation7 + $0x178] sm:$0xff] }
  0x64   :  { %v743_v6 = vpack.c.bf16 %v331_v5, %v330_v4 }
  0x65   :  { %692 = vmatpush3.bf16.msra.mxu0 %v691_v10 }
  0x66   :  { %724 = vmatpush3.bf16.msra.mxu1 %v723_v11  ;;  %694 = vmatprep.subr.bf16.mxu0 %v693_v12 }
  0x67   :  { %726 = vmatprep.subr.bf16.mxu1 %v725_v16 }
  0x69   :  { %696 = vmatpush3.bf16.msra.mxu0 %v695_v22 }
  0x6a   :  { %728 = vmatpush3.bf16.msra.mxu1 %v727_v23  ;;  %698 = vmatprep.subr.bf16.mxu0 %v697_v24 }
  0x6b   :  { %730 = vmatprep.subr.bf16.mxu1 %v729_v28 }
  0x6d   :  { %700 = vmatpush3.bf16.msra.mxu0 %v699_v34 }
  0x6e   :  { %732 = vmatpush3.bf16.msra.mxu1 %v731_v35  ;;  %702 = vmatprep.subr.bf16.mxu0 %v701_v36 }
  0x6f   :  { %734 = vmatprep.subr.bf16.mxu1 %v733_v40 }
  0x71   :  { %704 = vmatpush3.bf16.msra.mxu0 %v703_v47 }
  0x72   :  { %736 = vmatpush3.bf16.msra.mxu1 %v735_v48  ;;  %706 = vmatprep.subr.bf16.mxu0 %v705_v49 }
  0x73   :  { %738 = vmatprep.subr.bf16.mxu1 %v737_v52 }
  0x75   :  { %708 = vmatpush3.bf16.msra.mxu0 %v707_v55 }
  0x76   :  { %740 = vmatpush3.bf16.msra.mxu1 %v739_v56  ;;  %710 = vmatprep.subr.bf16.mxu0 %v709_v61 }
  0x77   :  { %742 = vmatprep.subr.bf16.mxu1 %v741_v2 }
  0x79   :  { %712 = vmatpush3.bf16.msra.mxu0 %v711_v3 }
  0x7a   :  { %744 = vmatpush3.bf16.msra.mxu1 %v743_v6 }
 0x12e   :  { %v188_v7 = vpop.f32.mrb[0].mxu0 }
 0x12f   :  { %v265_v8 = vpop.f32.mrb[0].mxu1  ;;  %v190_v9 = vpop.f32.mrb[1].mxu0  ;;  %v276_v12 = vmax.f32 %v188_v7, 0.0 }
 0x130   :  { %v278_v0 = vmax.f32 %v265_v8, 0.0  ;;  %v277_v10 = vmax.f32 %v190_v9, 0.0  ;;  %v267_v11 = vpop.f32.mrb[1].mxu1 }
 0x131   :  { %v279_v13 = vmax.f32 %v267_v11, 0.0 }
 0x132   :  { %v194_v14 = vpop.f32.mrb[2].mxu0  ;;  %412 = vmatprep.mubr.f32.mxu0 %v277_v10 }
 0x133   :  { %v271_v15 = vpop.f32.mrb[2].mxu1  ;;  %487 = vmatprep.mubr.f32.mxu1 %v279_v13  ;;  %v196_v16 = vpop.f32.mrb[3].mxu0  ;;  %413 = vmatmul.mubr.f32.vlgmr.msra.gmra.mrb[4].mxu0 %v276_v12  ;;  %v280_v20 = vmax.f32 %v194_v14, 0.0 }
 0x134   :  { %v282_v17 = vmax.f32 %v271_v15, 0.0  ;;  %v281_v18 = vmax.f32 %v196_v16, 0.0  ;;  %v273_v19 = vpop.f32.mrb[3].mxu1  ;;  %488 = vmatmul.mubr.f32.vlgmr.msra.gmra.mrb[4].mxu1 %v278_v0 }
 0x135   :  { %v283_v21 = vmax.f32 %v273_v19, 0.0 }
 0x136   :  { %417 = vmatprep.mubr.f32.mxu0 %v281_v18 }
 0x137   :  { %492 = vmatprep.mubr.f32.mxu1 %v283_v21  ;;  %418 = vmatmul.mubr.f32.gmra.mrb[6].mxu0 %v280_v20 }
 0x138   :  { %493 = vmatmul.mubr.f32.gmra.mrb[6].mxu1 %v282_v17 }
 0x206   :  { %v573_v22 = vpop.f32.mrb[4].mxu0 }
 0x207   :  { %v611_v23 = vpop.f32.mrb[4].mxu1  ;;  %v574_v24 = vpop.f32.mrb[5].mxu0 }
 0x208   :  { %v575_v25 = vadd.f32 %v574_v24, %v573_v22  ;;  %v612_v26 = vpop.f32.mrb[5].mxu1 }
 0x209   :  { %v613_v27 = vadd.f32 %v612_v26, %v611_v23 }
 0x20a   :  { %v415_v28 = vadd.f32 %v575_v25, %v925_v46  ;;  %v576_v29 = vpop.f32.mrb[6].mxu0 }
 0x20b   :  { %v614_v30 = vpop.f32.mrb[6].mxu1  ;;  %v577_v31 = vpop.f32.mrb[7].mxu0 }
 0x20c   :  { %v578_v32 = vadd.f32 %v577_v31, %v576_v29  ;;  %v615_v33 = vpop.f32.mrb[7].mxu1  ;;  %v490_v34 = vadd.f32 %v613_v27, %v415_v28 }
 0x20d   :  { %v616_v35 = vadd.f32 %v615_v33, %v614_v30 }
 0x20e   :  { %v420_v36 = vadd.f32 %v578_v32, %v930_v59  ;;  %498 = vadd.xlane.f32.xlu0 %v490_v34 }
 0x210   :  { %v495_v37 = vadd.f32 %v616_v35, %v420_v36 }
 0x212   :  { %500 = vadd.xlane.f32.xlu0 %v495_v37 }
 0x29b   :  { %v499_v38 = vpop.xlane.xlu0 %498 }
 0x29c   :  { %v503_v39 = vmul.f32 0.0078125, %v499_v38 }
 0x29e   :  { %v505_v40 = vsub.f32 %v490_v34, %v503_v39 }
 0x29f   :  { %v501_v41 = vpop.xlane.xlu0 %500 }
 0x2a0   :  { %v504_v42 = vmul.f32 0.0078125, %v501_v41  ;;  %v507_v43 = vmul.f32 %v505_v40, %v505_v40 }
 0x2a2   :  { %v506_v44 = vsub.f32 %v495_v37, %v504_v42  ;;  %509 = vadd.xlane.f32.xlu1 %v507_v43 }
 0x2a4   :  { %v508_v46 = vmul.f32 %v506_v44, %v506_v44 }
 0x2a6   :  { %511 = vadd.xlane.f32.xlu1 %v508_v46 }
 0x32f   :  { %v510_v45 = vpop.xlane.xlu1 %509 }
 0x330   :  { %v513_v47 = vmul.f32 0.0078125, %v510_v45 }
 0x332   :  { %v515_v48 = vadd.f32 1e-05, %v513_v47 }
 0x333   :  { %v512_v49 = vpop.xlane.xlu1 %511 }
 0x334   :  { %754 = vrsqrt.f32 %v515_v48  ;;  %v514_v50 = vmul.f32 0.0078125, %v512_v49 }
 0x336   :  { %v516_v59 = vadd.f32 1e-05, %v514_v50 }
 0x338   :  { %756 = vrsqrt.f32 %v516_v59 }
 0x33e   :  { %v755_v51 = vpop.eup %754 }
 0x33f   :  { %v519_v52 = vmul.f32 %v755_v51, %v505_v40 }
 0x341   :  { %521 = vst [vmem:[#allocation8] sm:$0xff] %v519_v52 }
 0x342   :  { %v757_v53 = vpop.eup %756 }
 0x343   :  { %v520_v54 = vmul.f32 %v757_v53, %v506_v44 }
 0x345   :  { %522 = vst [vmem:[#allocation8 + $0x8] sm:$0xff] %v520_v54 }
 0x346   :  { %835 = shalt.err (!%p832_p0)
}
 0x347   :  { %s836_s27 = scalar_lea.hbm %s955_s3, 256 }
 0x348   :  { %p837_p1 = scmp.ne.s32.totalorder %s955_s3, %s836_s27  ;;  %p840_p2 = scmp.lt.u32.totalorder %s836_s27, %s955_s3 }
 0x34a   :  { %p842_p3 = pnand %p840_p2, %p837_p1 }
 0x34c   :  { %845 = shalt.err (!%p842_p3)
}
 0x34d   :  { %534 = dma.vmem_to_hbm [thread:$0]  %s529_s23, 256, %s955_s3, [#allocation4], %s856_s1, %s856_s1, %s857_s9  }
 0x34e   :  { %850 = dma.done.wait [#allocation4], 256  }
 0x34f   :  { %851 = vsyncadd [#allocation4], 4294967040 }
 0x350   :  { %538 = vsyncpa [#allocation3], 1 }
 0x351   :  { %539 = vsyncpa [#allocation6], 1 }
 0x352   :  { %540 = vsyncpa [#allocation4], 1 }

</bundles_post_ra>
